<compile_context>
chip_gen: v5e
topology: v5e:2x2
jax: 0.10.0
libtpu: 0.0.40
codegen_flags: <defaults>
</compile_context>

<pallas_src>
import functools
import math

import jax
import jax.numpy as jnp
from jax.experimental import pallas as pl
from jax.experimental.pallas import tpu as pltpu

NEG_INF = -1e30  # finite additive "masked" value (exp -> 0); safe for causal masks


def _sublane_align(dtype):
    # second-to-last block dim alignment by element size (f32:8, bf16:16, int8/fp8:32)
    return {4: 8, 2: 16, 1: 32}.get(jnp.dtype(dtype).itemsize, 8)


def _pick_tile(dim, preferred, align):
    """Largest tile <= `preferred` that divides `dim` and is a multiple of `align`.
    Falls back to the full dim (a block equal to the full array dim is always legal)."""
    if dim <= preferred:
        return dim
    t = (preferred // align) * align
    while t >= align:
        if dim % t == 0:
            return t
        t -= align
    return dim


def _pick_head_block(n_head, hs):
    """Smallest divisor of n_head whose packed lane width (hb*hs) is a 128 multiple."""
    for hb in range(1, n_head + 1):
        if n_head % hb == 0 and (hb * hs) % 128 == 0 and hb * hs <= 512:
            return hb
    return n_head  # fallback: full C block (equal to full array dim -> always legal)


def _vmem_limit(nbytes):
    # double-buffered blocks + scratch + 4 MiB headroom, clamped to [16, 32] MiB.
    return int(min(max(nbytes + (4 << 20), 16 << 20), 32 << 20))


# ----------------------------------------------------------------------------
# NT matmul (x @ W.T with W stored as nn.Linear (out_features, in_features))
# ----------------------------------------------------------------------------
def _matmul_nt_kernel_direct(a_ref, b_ref, o_ref):
    # f32 output: accumulate straight into the resident output block.
    @pl.when(pl.program_id(2) == 0)
    def _():
        o_ref[...] = jnp.zeros_like(o_ref)

    o_ref[...] += jax.lax.dot_general(
        a_ref[...], b_ref[...], (((1,), (1,)), ((), ())),
        preferred_element_type=jnp.float32)


def _matmul_nt_kernel_scratch(a_ref, b_ref, o_ref, acc_ref):
    @pl.when(pl.program_id(2) == 0)
    def _():
        acc_ref[...] = jnp.zeros_like(acc_ref)

    acc_ref[...] += jax.lax.dot_general(
        a_ref[...], b_ref[...], (((1,), (1,)), ((), ())),
        preferred_element_type=jnp.float32)

    @pl.when(pl.program_id(2) == pl.num_programs(2) - 1)
    def _():
        o_ref[...] = acc_ref[...].astype(o_ref.dtype)


def matmul_nt(a, w, *, tm_pref=256, tn_pref=512, tk_pref=512):
    """a: (M, K); w: (N, K) untransposed nn.Linear weight. Returns a @ w.T as (M, N)."""
    M, K = a.shape
    N, K2 = w.shape
    assert K == K2
    out_dtype = a.dtype

    tm = _pick_tile(M, tm_pref, _sublane_align(a.dtype))
    tn = _pick_tile(N, tn_pref, 128)
    tk = _pick_tile(K, tk_pref, 128)
    grid = (M // tm, N // tn, K // tk)

    direct = jnp.dtype(out_dtype) == jnp.dtype(jnp.float32)
    kernel = _matmul_nt_kernel_direct if direct else _matmul_nt_kernel_scratch
    scratch = [] if direct else [pltpu.VMEM((tm, tn), jnp.float32)]

    a_item = jnp.dtype(a.dtype).itemsize
    w_item = jnp.dtype(w.dtype).itemsize
    o_item = jnp.dtype(out_dtype).itemsize
    block_bytes = tm * tk * a_item + tn * tk * w_item + tm * tn * o_item
    scratch_bytes = 0 if direct else tm * tn * 4

    return pl.pallas_call(
        kernel,
        out_shape=jax.ShapeDtypeStruct((M, N), out_dtype),
        grid_spec=pltpu.PrefetchScalarGridSpec(
            num_scalar_prefetch=0,
            grid=grid,
            in_specs=[
                pl.BlockSpec((tm, tk), lambda i, j, k: (i, k)),
                pl.BlockSpec((tn, tk), lambda i, j, k: (j, k)),
            ],
            out_specs=pl.BlockSpec((tm, tn), lambda i, j, k: (i, j)),
            scratch_shapes=scratch,
        ),
        compiler_params=pltpu.CompilerParams(
            dimension_semantics=("parallel", "parallel", "arbitrary"),
            vmem_limit_bytes=_vmem_limit(2 * block_bytes + scratch_bytes),
        ),
    )(a, w)


# ----------------------------------------------------------------------------
# Flash attention: causal mask generated in-kernel, Hblk heads packed per step,
# online softmax with f32 statistics, output written directly in (B, T, C) layout.
# ----------------------------------------------------------------------------
def _flash_kernel(q_ref, k_ref, v_ref, o_ref, m_sc, l_sc, acc_sc,
                  *, scale, hs, hblk, tq, tkv):
    qi = pl.program_id(2)
    ki = pl.program_id(3)

    @pl.when(ki == 0)
    def _():
        m_sc[...] = jnp.full_like(m_sc, -jnp.inf)
        l_sc[...] = jnp.zeros_like(l_sc)
        acc_sc[...] = jnp.zeros_like(acc_sc)

    # Skip KV blocks entirely above the causal diagonal.
    @pl.when(ki * tkv < (qi + 1) * tq)
    def _():
        q = q_ref[0] * scale                 # (tq, hblk*hs); fold 1/sqrt(hs) into q
        k = k_ref[0]                         # (tkv, hblk*hs)
        v = v_ref[0]                         # (tkv, hblk*hs)

        row = qi * tq + jax.lax.broadcasted_iota(jnp.int32, (tq, tkv), 0)
        col = ki * tkv + jax.lax.broadcasted_iota(jnp.int32, (tq, tkv), 1)
        visible = row >= col

        for h in range(hblk):                # static unroll over packed heads
            sl = slice(h * hs, (h + 1) * hs)
            s = jax.lax.dot_general(q[:, sl], k[:, sl], (((1,), (1,)), ((), ())),
                                    preferred_element_type=jnp.float32)
            s = jnp.where(visible, s, NEG_INF)

            m_prev = m_sc[h]                 # (tq, 1)
            m_new = jnp.maximum(m_prev, s.max(axis=-1, keepdims=True))
            alpha = jnp.exp(m_prev - m_new)
            p = jnp.exp(s - m_new)
            l_sc[h] = alpha * l_sc[h] + p.sum(axis=-1, keepdims=True)
            acc_sc[:, sl] = alpha * acc_sc[:, sl] + jnp.dot(
                p.astype(v.dtype), v[:, sl], preferred_element_type=jnp.float32)
            m_sc[h] = m_new

    @pl.when(ki == pl.num_programs(3) - 1)
    def _():
        for h in range(hblk):
            sl = slice(h * hs, (h + 1) * hs)
            acc_sc[:, sl] = acc_sc[:, sl] * pl.reciprocal(l_sc[h], approx=True)
        o_ref[0] = acc_sc[...].astype(o_ref.dtype)   # single lane-dense store


def flash_attention(q, k, v, n_head, *, tq_pref=256, tkv_pref=512):
    """q, k, v: (B, T, C) with heads contiguous along C. Returns (B, T, C)."""
    B, T, C = q.shape
    hs = C // n_head
    hblk = _pick_head_block(n_head, hs)
    dh = hblk * hs
    n_groups = n_head // hblk
    scale = 1.0 / math.sqrt(hs)

    tq = _pick_tile(T, tq_pref, _sublane_align(q.dtype))
    tkv = _pick_tile(T, tkv_pref, 128 if T % 128 == 0 else _sublane_align(q.dtype))
    grid = (B, n_groups, T // tq, T // tkv)

    def q_map(b, g, qi, ki):
        return (b, qi, g)

    def kv_map(b, g, qi, ki):
        # Clamp to the last causally-needed KV block: skipped blocks issue no new DMA.
        last_needed = ((qi + 1) * tq - 1) // tkv
        return (b, jnp.minimum(ki, last_needed), g)

    item = jnp.dtype(q.dtype).itemsize
    block_bytes = (2 * tq * dh + 2 * tkv * dh) * item
    scratch_bytes = (2 * hblk * tq + tq * dh) * 4

    return pl.pallas_call(
        functools.partial(_flash_kernel, scale=scale, hs=hs, hblk=hblk, tq=tq, tkv=tkv),
        out_shape=jax.ShapeDtypeStruct((B, T, C), q.dtype),
        grid_spec=pltpu.PrefetchScalarGridSpec(
            num_scalar_prefetch=0,
            grid=grid,
            in_specs=[
                pl.BlockSpec((1, tq, dh), q_map),
                pl.BlockSpec((1, tkv, dh), kv_map),
                pl.BlockSpec((1, tkv, dh), kv_map),
            ],
            out_specs=pl.BlockSpec((1, tq, dh), q_map),
            scratch_shapes=[
                pltpu.VMEM((hblk, tq, 1), jnp.float32),   # running max per head
                pltpu.VMEM((hblk, tq, 1), jnp.float32),   # running denom per head
                pltpu.VMEM((tq, dh), jnp.float32),        # lane-dense output accumulator
            ],
        ),
        compiler_params=pltpu.CompilerParams(
            dimension_semantics=("parallel", "parallel", "parallel", "arbitrary"),
            vmem_limit_bytes=_vmem_limit(2 * block_bytes + scratch_bytes),
        ),
    )(q, k, v)


# ----------------------------------------------------------------------------
# RoPE (interleaved even/odd pair rotation, matching jamo apply_rope) on (B, T, C).
# Elementwise in the (B, T, C) layout: no transposes, one fused pass over q / k.
# ----------------------------------------------------------------------------
def apply_rope_btc(x, rope_cache, n_head):
    B, T, C = x.shape
    hs = C // n_head
    rc = rope_cache[:T].astype(jnp.float32)                       # (T, hs//2, 2)
    xs = x.astype(jnp.float32).reshape(B, T, n_head, hs // 2, 2)
    c = rc[None, :, None, :, 0]
    s = rc[None, :, None, :, 1]
    x0, x1 = xs[..., 0], xs[..., 1]
    out = jnp.stack([x0 * c - x1 * s, x1 * c + x0 * s], axis=-1)
    return out.reshape(B, T, C).astype(x.dtype)


# ----------------------------------------------------------------------------
# Full CasualAttention forward (kv_cache=None path)
# ----------------------------------------------------------------------------
def casual_attention_forward(x, rope, mask, w_attn, w_proj, n_head):
    """x: (B, T, C); rope: (>=T, hs//2, 2); mask: module's causal mask_cache slice
    (unused — causal structure is generated in-kernel); w_attn: (3C, C); w_proj: (C, C)."""
    del mask  # causal mask is generated inside the flash kernel
    B, T, C = x.shape

    qkv = matmul_nt(x.reshape(B * T, C), w_attn).reshape(B, T, 3 * C)
    q, k, v = jnp.split(qkv, 3, axis=-1)          # each (B, T, C), heads contiguous on C

    q = apply_rope_btc(q, rope, n_head)
    k = apply_rope_btc(k, rope, n_head)

    y = flash_attention(q, k, v, n_head)          # (B, T, C) — already in output layout
    out = matmul_nt(y.reshape(B * T, C), w_proj)  # (B*T, C)
    return out.reshape(B, T, C)


# ----------------------------------------------------------------------------
# Pure-JAX reference for correctness check
# ----------------------------------------------------------------------------
def _ref_attention(x, rope, mask, w_attn, w_proj, n_head):
    B, T, C = x.shape
    hs = C // n_head
    qkv = x.reshape(B * T, C) @ w_attn.T
    q, k, v = jnp.split(qkv.reshape(B, T, 3 * C), 3, axis=-1)
    q = apply_rope_btc(q, rope, n_head).reshape(B, T, n_head, hs).transpose(0, 2, 1, 3)
    k = apply_rope_btc(k, rope, n_head).reshape(B, T, n_head, hs).transpose(0, 2, 1, 3)
    v = v.reshape(B, T, n_head, hs).transpose(0, 2, 1, 3)
    att = jnp.einsum("bhqd,bhkd->bhqk", q, k) / math.sqrt(hs)
    m2 = jnp.asarray(mask).reshape(-1, T, T)[0]
    att = jnp.where(m2[None, None], att, -jnp.inf)
    att = jax.nn.softmax(att, axis=-1)
    y = jnp.einsum("bhqk,bhkd->bhqd", att, v)
    y = y.transpose(0, 2, 1, 3).reshape(B * T, C)
    return (y @ w_proj.T).reshape(B, T, C)


if __name__ == "__main__":
    key = jax.random.PRNGKey(0)
    B, T, C, H = 2, 16, 128, 4          # small config: n_embd=128, n_heads=4, head_size=32
    hs = C // H

    k1, k2, k3 = jax.random.split(key, 3)
    x = jax.random.normal(k1, (B, T, C), dtype=jnp.float32)
    w_attn = jax.random.normal(k2, (3 * C, C), dtype=jnp.float32) * 0.05   # nn.Linear (out, in)
    w_proj = jax.random.normal(k3, (C, C), dtype=jnp.float32) * 0.05

    # RoPE cache (block_size, hs//2, 2) of (cos, sin), theta=10000 (jamo build_rope_cache).
    pos = jnp.arange(T, dtype=jnp.float32)
    inv_freq = 1.0 / (10000.0 ** (jnp.arange(0, hs, 2, dtype=jnp.float32) / hs))
    angles = pos[:, None] * inv_freq[None, :]
    rope = jnp.stack([jnp.cos(angles), jnp.sin(angles)], axis=-1)          # (T, hs//2, 2)

    # Causal boolean mask (1, 1, T, T), as the module's mask_cache slice would be.
    mask = jnp.tril(jnp.ones((T, T), dtype=jnp.bool_))[None, None]

    out = casual_attention_forward(x, rope, mask, w_attn, w_proj, H)
    jax.block_until_ready(out)

    ref = _ref_attention(x, rope, mask, w_attn, w_proj, H)
    assert out.shape == (B, T, C)
    err = float(jnp.max(jnp.abs(out - ref)))
    assert jnp.allclose(out, ref, atol=2e-2, rtol=2e-2), (
        "mismatch vs reference, max abs diff = %f" % err)

    print("KERNEL_OK")
</pallas_src>

<mosaic_0001>
module attributes {stable_mosaic.version = 11 : i64} {
  func.func @_matmul_nt_kernel_direct(%arg0: i32, %arg1: i32, %arg2: i32, %arg3: memref<32x128xf32, #tpu.memory_space<vmem>>, %arg4: memref<384x128xf32, #tpu.memory_space<vmem>>, %arg5: memref<32x384xf32, #tpu.memory_space<vmem>>) attributes {dimension_semantics = [#tpu.dimension_semantics<parallel>, #tpu.dimension_semantics<parallel>, #tpu.dimension_semantics<arbitrary>], iteration_bounds = array<i64: 1, 1, 1>, scalar_prefetch = 0 : i64, scratch_operands = 0 : i64, tpu.core_type = #tpu.core_type<tc>, window_params = [{transform_indices = @transform_0, window_bounds = array<i64: 32, 128>}, {transform_indices = @transform_1, window_bounds = array<i64: 384, 128>}, {transform_indices = @transform_2, window_bounds = array<i64: 32, 384>}]} {
    %c0_i32 = arith.constant 0 : i32
    %0 = arith.cmpi eq, %arg2, %c0_i32 : i32
    %1 = arith.extui %0 : i1 to i32
    %c0_i32_0 = arith.constant 0 : i32
    %2 = arith.cmpi ne, %1, %c0_i32_0 : i32
    scf.if %2 {
      %cst_8 = arith.constant 0.000000e+00 : f32
      %9 = vector.broadcast %cst_8 : f32 to vector<32x384xf32>
      %c0_9 = arith.constant 0 : index
      %c0_10 = arith.constant 0 : index
      %10 = vector.load %arg5[%c0_9, %c0_10] : memref<32x384xf32, #tpu.memory_space<vmem>>, vector<32x384xf32>
      tpu.vector_store %arg5[%c0_9, %c0_10], %9 {strides = array<i32>} : memref<32x384xf32, #tpu.memory_space<vmem>>, vector<32x384xf32>,
    } else {
    }
    %c0 = arith.constant 0 : index
    %c0_1 = arith.constant 0 : index
    %3 = vector.load %arg5[%c0, %c0_1] : memref<32x384xf32, #tpu.memory_space<vmem>>, vector<32x384xf32>
    %c0_2 = arith.constant 0 : index
    %c0_3 = arith.constant 0 : index
    %4 = vector.load %arg3[%c0_2, %c0_3] : memref<32x128xf32, #tpu.memory_space<vmem>>, vector<32x128xf32>
    %c0_4 = arith.constant 0 : index
    %c0_5 = arith.constant 0 : index
    %5 = vector.load %arg4[%c0_4, %c0_5] : memref<384x128xf32, #tpu.memory_space<vmem>>, vector<384x128xf32>
    %cst = arith.constant dense<0.000000e+00> : vector<32x384xf32>
    %6 = tpu.matmul %4, %5, %cst {dimension_numbers = #tpu.dot_dimension_numbers<[1], [1], [0], [0], [0, 0, 1, 0], [], []>} : vector<32x128xf32>, vector<384x128xf32>, vector<32x384xf32> -> vector<32x384xf32>
    %7 = arith.addf %3, %6 : vector<32x384xf32>
    %c0_6 = arith.constant 0 : index
    %c0_7 = arith.constant 0 : index
    %8 = vector.load %arg5[%c0_6, %c0_7] : memref<32x384xf32, #tpu.memory_space<vmem>>, vector<32x384xf32>
    tpu.vector_store %arg5[%c0_6, %c0_7], %7 {strides = array<i32>} : memref<32x384xf32, #tpu.memory_space<vmem>>, vector<32x384xf32>,
    return
  }
  func.func @transform_0(%arg0: i32, %arg1: i32, %arg2: i32) -> (i32, i32) {
    %c0_i32 = arith.constant 0 : i32
    return %arg0, %arg2 : i32, i32
  }
  func.func @transform_1(%arg0: i32, %arg1: i32, %arg2: i32) -> (i32, i32) {
    %c0_i32 = arith.constant 0 : i32
    return %arg1, %arg2 : i32, i32
  }
  func.func @transform_2(%arg0: i32, %arg1: i32, %arg2: i32) -> (i32, i32) {
    %c0_i32 = arith.constant 0 : i32
    return %arg0, %arg1 : i32, i32
  }
}

</mosaic_0001>

<bundles_post_ra>
// kernel: tpu_custom_call.1
= control target key start
LH: loop header
LB: loop body
LE: loop exit
PB: predicated region body
PF: predicated region fallthrough
CT: control target
= control target key end

     0   :  { %7 = vsyncpa [#allocation3], 0  ;;  %s388_s0 = inlined_call_operand.hbm [shape: f32[32,128], index: 0, kind: input, shape index: {}]   ;;  %s389_s1 = inlined_call_operand.hbm [shape: f32[384,128], index: 1, kind: input, shape index: {}]   ;;  %s390_s2 = inlined_call_operand.hbm [shape: f32[32,384], index: 2, kind: output, shape index: {}]  }
   0x1   :  { %8 = vsyncpa [#allocation6], 0 }
   0x2   :  { %9 = vsyncpa [#allocation4], 0  ;;  %s14_s11 = sshll.u32 %s388_s0, 4  ;;  %s357_s12 = smov [#allocation2]   ;;  %s15_s11 = int_to_ptr.hbm [resolvable:$true] %s14_s11 }
   0x3   :  { %s16_s13 = sshll.u32 %s357_s12, 4  ;;  %s27_s16 = sshll.u32 %s389_s1, 4  ;;  %s17_s13 = int_to_ptr.vmem [resolvable:$true] %s16_s13  ;;  %s28_s16 = int_to_ptr.hbm [resolvable:$true] %s27_s16 }
   0x4   :  { %s358_s17 = smov 128   ;;  %s359_s18 = smov 8  }
   0x5   :  { %22 = dma.hbm_to_vmem [thread:$0]  %s15_s11, 512, %s17_s13, [#allocation3], %s358_s17, %s358_s17, %s359_s18  }
   0x6   :  { %s360_s19 = smov [#allocation5]  }
   0x7   :  { %s29_s20 = sshll.u32 %s360_s19, 4  ;;  %s30_s20 = int_to_ptr.vmem [resolvable:$true] %s29_s20 }
   0x8   :  { %35 = dma.hbm_to_vmem [thread:$0]  %s28_s16, 6144, %s30_s20, [#allocation6], %s358_s17, %s358_s17, %s359_s18  }
   0x9   :  { %351 = dma.done.wait [#allocation3], 512  }
   0xa   :  { %352 = vsyncadd [#allocation3], 4294966784 }
   0xb   :  { %353 = dma.done.wait [#allocation6], 6144  }
   0xc   :  { %354 = vsyncadd [#allocation6], 4294961152  ;;  %v123_v0 = vld [vmem:[#allocation5 + $0x178] sm:$0xff]  ;;  %v122_v3 = vld [vmem:[#allocation5 + $0x170] sm:$0xff]  ;;  %s361_s0 = smov [#allocation7]   ;;  %s241_s23 = sshll.u32 %s390_s2, 4  ;;  %s242_s23 = int_to_ptr.hbm [resolvable:$true] %s241_s23 }
   0xd   :  { %v107_v1 = vld [vmem:[#allocation5 + $0xf8] sm:$0xff]  ;;  %182 = vmatpush.xpose.msra.mxu2 %v123_v0  ;;  %v106_v4 = vld [vmem:[#allocation5 + $0xf0] sm:$0xff]  ;;  %v121_v6 = vld [vmem:[#allocation5 + $0x168] sm:$0xff]  ;;  %s239_s1 = sshll.u32 %s361_s0, 4  ;;  %s362_s24 = smov 384   ;;  %s240_s1 = int_to_ptr.vmem [resolvable:$true] %s239_s1 }
   0xe   :  { %153 = vmatpush.xpose.msra.mxu1 %v107_v1  ;;  %v91_v2 = vld [vmem:[#allocation5 + $0x78] sm:$0xff]  ;;  %v90_v5 = vld [vmem:[#allocation5 + $0x70] sm:$0xff]  ;;  %v105_v7 = vld [vmem:[#allocation5 + $0xe8] sm:$0xff]  ;;  %s363_s25 = smov 24  }
   0xf   :  { %255 = vmatpush.xpose.msra.mxu3 %v91_v2  ;;  %124 = vmatpush.xpose.msra.mxu0 %v91_v2  ;;  %v89_v8 = vld [vmem:[#allocation5 + $0x68] sm:$0xff]  ;;  %v120_v9 = vld [vmem:[#allocation5 + $0x160] sm:$0xff]  ;;  %v119_v12 = vld [vmem:[#allocation5 + $0x158] sm:$0xff] }
  0x10   :  { %v104_v10 = vld [vmem:[#allocation5 + $0xe0] sm:$0xff]  ;;  %v103_v13 = vld [vmem:[#allocation5 + $0xd8] sm:$0xff]  ;;  %v118_v15 = vld [vmem:[#allocation5 + $0x150] sm:$0xff] }
  0x11   :  { %183 = vmatpush.xpose.msra.mxu2 %v122_v3  ;;  %v88_v11 = vld [vmem:[#allocation5 + $0x60] sm:$0xff]  ;;  %v87_v14 = vld [vmem:[#allocation5 + $0x58] sm:$0xff]  ;;  %v102_v16 = vld [vmem:[#allocation5 + $0xd0] sm:$0xff] }
  0x12   :  { %154 = vmatpush.xpose.msra.mxu1 %v106_v4  ;;  %v86_v17 = vld [vmem:[#allocation5 + $0x50] sm:$0xff]  ;;  %v117_v18 = vld [vmem:[#allocation5 + $0x148] sm:$0xff]  ;;  %v116_v21 = vld [vmem:[#allocation5 + $0x140] sm:$0xff] }
  0x13   :  { %256 = vmatpush.xpose.msra.mxu3 %v90_v5  ;;  %125 = vmatpush.xpose.msra.mxu0 %v90_v5  ;;  %v101_v19 = vld [vmem:[#allocation5 + $0xc8] sm:$0xff]  ;;  %v100_v22 = vld [vmem:[#allocation5 + $0xc0] sm:$0xff]  ;;  %v115_v24 = vld [vmem:[#allocation5 + $0x138] sm:$0xff] }
  0x14   :  { %v85_v20 = vld [vmem:[#allocation5 + $0x48] sm:$0xff]  ;;  %v84_v23 = vld [vmem:[#allocation5 + $0x40] sm:$0xff]  ;;  %v99_v25 = vld [vmem:[#allocation5 + $0xb8] sm:$0xff] }
  0x15   :  { %184 = vmatpush.xpose.msra.mxu2 %v121_v6  ;;  %v83_v26 = vld [vmem:[#allocation5 + $0x38] sm:$0xff]  ;;  %v114_v27 = vld [vmem:[#allocation5 + $0x130] sm:$0xff]  ;;  %v113_v30 = vld [vmem:[#allocation5 + $0x128] sm:$0xff] }
  0x16   :  { %155 = vmatpush.xpose.msra.mxu1 %v105_v7  ;;  %v98_v28 = vld [vmem:[#allocation5 + $0xb0] sm:$0xff]  ;;  %v97_v31 = vld [vmem:[#allocation5 + $0xa8] sm:$0xff]  ;;  %v112_v33 = vld [vmem:[#allocation5 + $0x120] sm:$0xff] }
  0x17   :  { %257 = vmatpush.xpose.msra.mxu3 %v89_v8  ;;  %126 = vmatpush.xpose.msra.mxu0 %v89_v8  ;;  %v82_v29 = vld [vmem:[#allocation5 + $0x30] sm:$0xff]  ;;  %v81_v32 = vld [vmem:[#allocation5 + $0x28] sm:$0xff]  ;;  %v96_v34 = vld [vmem:[#allocation5 + $0xa0] sm:$0xff] }
  0x18   :  { %v80_v35 = vld [vmem:[#allocation5 + $0x20] sm:$0xff]  ;;  %v111_v36 = vld [vmem:[#allocation5 + $0x118] sm:$0xff]  ;;  %v110_v39 = vld [vmem:[#allocation5 + $0x110] sm:$0xff] }
  0x19   :  { %185 = vmatpush.xpose.msra.mxu2 %v120_v9  ;;  %v95_v37 = vld [vmem:[#allocation5 + $0x98] sm:$0xff]  ;;  %v94_v40 = vld [vmem:[#allocation5 + $0x90] sm:$0xff]  ;;  %v109_v42 = vld [vmem:[#allocation5 + $0x108] sm:$0xff] }
  0x1a   :  { %156 = vmatpush.xpose.msra.mxu1 %v104_v10  ;;  %v79_v38 = vld [vmem:[#allocation5 + $0x18] sm:$0xff]  ;;  %v78_v41 = vld [vmem:[#allocation5 + $0x10] sm:$0xff]  ;;  %v93_v43 = vld [vmem:[#allocation5 + $0x88] sm:$0xff] }
  0x1b   :  { %258 = vmatpush.xpose.msra.mxu3 %v88_v11  ;;  %127 = vmatpush.xpose.msra.mxu0 %v88_v11  ;;  %v77_v44 = vld [vmem:[#allocation5 + $0x8] sm:$0xff]  ;;  %v108_v45 = vld [vmem:[#allocation5 + $0x100] sm:$0xff]  ;;  %v74_v50 = vld [vmem:[#allocation2 + $0x10] sm:$0xff] }
  0x1c   :  { %v92_v46 = vld [vmem:[#allocation5 + $0x80] sm:$0xff]  ;;  %v73_v49 = vld [vmem:[#allocation2 + $0x8] sm:$0xff]  ;;  %v75_v51 = vld [vmem:[#allocation2 + $0x18] sm:$0xff] }
  0x1d   :  { %186 = vmatpush.xpose.msra.mxu2 %v119_v12  ;;  %v76_v47 = vld [vmem:[#allocation5] sm:$0xff] }
  0x1e   :  { %157 = vmatpush.xpose.msra.mxu1 %v103_v13  ;;  %v72_v48 = vld [vmem:[#allocation2] sm:$0xff] }
  0x1f   :  { %259 = vmatpush.xpose.msra.mxu3 %v87_v14  ;;  %128 = vmatpush.xpose.msra.mxu0 %v87_v14 }
  0x21   :  { %187 = vmatpush.xpose.msra.mxu2 %v118_v15 }
  0x22   :  { %158 = vmatpush.xpose.msra.mxu1 %v102_v16 }
  0x23   :  { %260 = vmatpush.xpose.msra.mxu3 %v86_v17  ;;  %129 = vmatpush.xpose.msra.mxu0 %v86_v17 }
  0x25   :  { %188 = vmatpush.xpose.msra.mxu2 %v117_v18 }
  0x26   :  { %159 = vmatpush.xpose.msra.mxu1 %v101_v19 }
  0x27   :  { %261 = vmatpush.xpose.msra.mxu3 %v85_v20  ;;  %130 = vmatpush.xpose.msra.mxu0 %v85_v20 }
  0x29   :  { %189 = vmatpush.xpose.msra.mxu2 %v116_v21 }
  0x2a   :  { %160 = vmatpush.xpose.msra.mxu1 %v100_v22 }
  0x2b   :  { %262 = vmatpush.xpose.msra.mxu3 %v84_v23  ;;  %131 = vmatpush.xpose.msra.mxu0 %v84_v23 }
  0x2d   :  { %190 = vmatpush.xpose.msra.mxu2 %v115_v24 }
  0x2e   :  { %161 = vmatpush.xpose.msra.mxu1 %v99_v25 }
  0x2f   :  { %263 = vmatpush.xpose.msra.mxu3 %v83_v26  ;;  %132 = vmatpush.xpose.msra.mxu0 %v83_v26 }
  0x31   :  { %191 = vmatpush.xpose.msra.mxu2 %v114_v27 }
  0x32   :  { %162 = vmatpush.xpose.msra.mxu1 %v98_v28 }
  0x33   :  { %264 = vmatpush.xpose.msra.mxu3 %v82_v29  ;;  %133 = vmatpush.xpose.msra.mxu0 %v82_v29 }
  0x35   :  { %192 = vmatpush.xpose.msra.mxu2 %v113_v30 }
  0x36   :  { %163 = vmatpush.xpose.msra.mxu1 %v97_v31 }
  0x37   :  { %265 = vmatpush.xpose.msra.mxu3 %v81_v32  ;;  %134 = vmatpush.xpose.msra.mxu0 %v81_v32 }
  0x39   :  { %193 = vmatpush.xpose.msra.mxu2 %v112_v33 }
  0x3a   :  { %164 = vmatpush.xpose.msra.mxu1 %v96_v34 }
  0x3b   :  { %266 = vmatpush.xpose.msra.mxu3 %v80_v35  ;;  %135 = vmatpush.xpose.msra.mxu0 %v80_v35 }
  0x3d   :  { %194 = vmatpush.xpose.msra.mxu2 %v111_v36 }
  0x3e   :  { %165 = vmatpush.xpose.msra.mxu1 %v95_v37 }
  0x3f   :  { %267 = vmatpush.xpose.msra.mxu3 %v79_v38  ;;  %136 = vmatpush.xpose.msra.mxu0 %v79_v38 }
  0x41   :  { %195 = vmatpush.xpose.msra.mxu2 %v110_v39 }
  0x42   :  { %166 = vmatpush.xpose.msra.mxu1 %v94_v40 }
  0x43   :  { %268 = vmatpush.xpose.msra.mxu3 %v78_v41  ;;  %137 = vmatpush.xpose.msra.mxu0 %v78_v41 }
  0x45   :  { %196 = vmatpush.xpose.msra.mxu2 %v109_v42 }
  0x46   :  { %167 = vmatpush.xpose.msra.mxu1 %v93_v43 }
  0x47   :  { %269 = vmatpush.xpose.msra.mxu3 %v77_v44  ;;  %138 = vmatpush.xpose.msra.mxu0 %v77_v44 }
  0x49   :  { %197 = vmatpush.xpose.msra.mxu2 %v108_v45 }
  0x4a   :  { %168 = vmatpush.xpose.msra.mxu1 %v92_v46 }
  0x4b   :  { %270 = vmatpush.xpose.msra.mxu3 %v76_v47  ;;  %139 = vmatpush.xpose.msra.mxu0 %v76_v47 }
  0x4c   :  { %198 = vmatmul.f32.vlgmr.msra.gmra.mxu2 %v72_v48 }
  0x4d   :  { %169 = vmatmul.f32.vlgmr.msra.gmra.mxu1 %v72_v48 }
  0x4e   :  { %143 = vmatmul.f32.vlgmr.msra.gmra.mxu3 %v73_v49  ;;  %140 = vmatmul.f32.vlgmr.msra.gmra.mxu0 %v72_v48 }
  0x54   :  { %201 = vmatmul.f32.gmra.mxu2 %v73_v49 }
  0x55   :  { %172 = vmatmul.f32.gmra.mxu1 %v73_v49 }
  0x56   :  { %146 = vmatmul.f32.gmra.mxu3 %v74_v50 }
  0x5c   :  { %204 = vmatmul.f32.gmra.mxu2 %v74_v50 }
  0x5d   :  { %175 = vmatmul.f32.gmra.mxu1 %v74_v50 }
  0x5e   :  { %149 = vmatmul.f32.gmra.mxu3 %v75_v51 }
  0x64   :  { %207 = vmatmul.f32.gmra.mxu2 %v75_v51 }
  0x65   :  { %178 = vmatmul.f32.gmra.mxu1 %v75_v51 }
  0xca   :  { %v170_v52 = vpop.f32.mrf.mxu1 }
  0xcb   :  { %v141_v53 = vpop.f32.mrf.mxu0  ;;  %224 = vst [vmem:[#allocation7 + $0x8] sm:$0xff] %v170_v52 }
  0xcc   :  { %223 = vst [vmem:[#allocation7] sm:$0xff] %v141_v53 }
  0xcf   :  { %v199_v54 = vpop.f32.mrf.mxu2 }
  0xd0   :  { %225 = vst [vmem:[#allocation7 + $0x10] sm:$0xff] %v199_v54 }
  0xd1   :  { %v144_v55 = vpop.f32.mrf.mxu3 }
  0xd2   :  { %v173_v56 = vpop.f32.mrf.mxu1  ;;  %226 = vst [vmem:[#allocation7 + $0x18] sm:$0xff] %v144_v55 }
  0xd3   :  { %227 = vst [vmem:[#allocation7 + $0x20] sm:$0xff] %v173_v56 }
  0xd7   :  { %v202_v57 = vpop.f32.mrf.mxu2 }
  0xd8   :  { %228 = vst [vmem:[#allocation7 + $0x28] sm:$0xff] %v202_v57 }
  0xd9   :  { %v147_v58 = vpop.f32.mrf.mxu3 }
  0xda   :  { %v176_v59 = vpop.f32.mrf.mxu1  ;;  %229 = vst [vmem:[#allocation7 + $0x30] sm:$0xff] %v147_v58 }
  0xdb   :  { %230 = vst [vmem:[#allocation7 + $0x38] sm:$0xff] %v176_v59 }
  0xdf   :  { %v205_v60 = vpop.f32.mrf.mxu2 }
  0xe0   :  { %231 = vst [vmem:[#allocation7 + $0x40] sm:$0xff] %v205_v60 }
  0xe1   :  { %v150_v61 = vpop.f32.mrf.mxu3 }
  0xe2   :  { %v179_v62 = vpop.f32.mrf.mxu1  ;;  %232 = vst [vmem:[#allocation7 + $0x48] sm:$0xff] %v150_v61 }
  0xe3   :  { %233 = vst [vmem:[#allocation7 + $0x50] sm:$0xff] %v179_v62 }
  0xe7   :  { %v208_v63 = vpop.f32.mrf.mxu2 }
  0xe8   :  { %234 = vst [vmem:[#allocation7 + $0x58] sm:$0xff] %v208_v63 }
  0xe9   :  { %247 = dma.vmem_to_hbm [thread:$0]  %s240_s1, 1536, %s242_s23, [#allocation4], %s362_s24, %s362_s24, %s363_s25  }
  0xea   :  { %355 = dma.done.wait [#allocation4], 1536  }
  0xeb   :  { %356 = vsyncadd [#allocation4], 4294965760 }
  0xec   :  { %252 = vsyncpa [#allocation3], 1 }
  0xed   :  { %253 = vsyncpa [#allocation6], 1 }
  0xee   :  { %254 = vsyncpa [#allocation4], 1 }

</bundles_post_ra>
